<compile_context>
chip_gen: v7x
topology: tpu7x:2x2x1
jax: 0.10.0
libtpu: 0.0.40
codegen_flags: <defaults>
</compile_context>

<pallas_src>
import jax
import jax.numpy as jnp
from jax.experimental import pallas as pl
from jax.experimental.pallas import tpu as pltpu

# TODO(synk): string tokenization (AutoTokenizer) has no Pallas equivalent;
# token ids / attention masks are synthesized deterministically in-script.

_LANES = 128
_SUBLANES = 32               # sublane multiple safe even for int8-packed input
_MAX_BLOCK_BYTES = 2 << 20   # ~2 MiB per int32 block buffer (all generations)
_SMALL_N = 1 << 16           # below this, plain jnp.where beats pallas dispatch
_MIN_ROWS_FOR_SPLIT = 512    # force >=2 grid steps above this (v7x megacore)
_MAX_FAST_COLS = 8192        # keep fast-path row blocks within the VMEM budget


def _round_up(x, m):
    return ((x + m - 1) // m) * m


def _label_mask_kernel(pad_token_id):
    pad = int(pad_token_id)  # Python literal -> no captured jax.Array consts

    def kernel(tgt_ref, mask_ref, labels_ref):
        mask = mask_ref[...].astype(jnp.int32)   # in-register widen (free, VPU)
        labels_ref[...] = jnp.where(mask == pad, -100, tgt_ref[...])

    return kernel


def _run_label_mask(tgt2d, mask2d, pad_token_id, *, allow_input_fusion=False):
    """pallas_call on a 2-D (rows, cols) slab; cols must be a multiple of 128."""
    rows, cols = tgt2d.shape
    assert cols % _LANES == 0

    bytes_per_row = cols * 4  # int32 target / labels dominate the traffic
    max_rows = max(_SUBLANES,
                   (_MAX_BLOCK_BYTES // bytes_per_row) // _SUBLANES * _SUBLANES)

    nsteps = pl.cdiv(rows, max_rows)
    if nsteps < 2 and rows >= 2 * _MIN_ROWS_FOR_SPLIT:
        nsteps = 2  # keep both v7x TensorCores busy on mid-size inputs
    block_rows = min(rows, _round_up(pl.cdiv(rows, nsteps), _SUBLANES))
    grid = pl.cdiv(rows, block_rows)  # ragged last tile; no round-up cliff

    spec = pl.BlockSpec((block_rows, cols), lambda i: (i, 0))
    cp_kwargs = dict(dimension_semantics=("parallel",))
    if allow_input_fusion:
        cp_kwargs["allow_input_fusion"] = [True, True]

    return pl.pallas_call(
        _label_mask_kernel(pad_token_id),
        out_shape=jax.ShapeDtypeStruct((rows, cols), jnp.int32),
        grid=(grid,),
        in_specs=[spec, spec],
        out_specs=spec,
        compiler_params=pltpu.CompilerParams(**cp_kwargs),
    )(tgt2d, mask2d)


def mask_labels(target_ids, decoder_attention_mask, pad_token_id, *,
                force_pallas=False):
    """labels = target_ids; labels[decoder_attention_mask == pad] = -100."""
    assert target_ids.shape == decoder_attention_mask.shape
    orig_shape = target_ids.shape
    n = target_ids.size
    pad = int(pad_token_id)

    # Tiny inputs / non-int32 targets: a fused XLA select is strictly faster
    # than the pallas custom-call dispatch and keeps the caller's label dtype.
    if (target_ids.dtype != jnp.int32 or n == 0
            or (n < _SMALL_N and not force_pallas)):
        neg100 = jnp.asarray(-100, dtype=target_ids.dtype)
        return jnp.where(decoder_attention_mask.astype(jnp.int32) == pad,
                         neg100, target_ids)

    mask = decoder_attention_mask
    if mask.dtype == jnp.bool_:
        mask = mask.astype(jnp.int8)  # keep HBM read at 1 B/element

    last = orig_shape[-1]
    if target_ids.ndim >= 2 and last % _LANES == 0 and last <= _MAX_FAST_COLS:
        # Fast path: already lane-aligned -- no pad / repack / slice passes.
        rows = n // last
        labels2d = _run_label_mask(target_ids.reshape(rows, last),
                                   mask.reshape(rows, last), pad)
        return labels2d.reshape(orig_shape)

    # Slow path: flatten + pad into a lane-dense [rows, 128] slab; the pad /
    # reshape producers are allowed to fuse into the pallas_call operands.
    rows = _round_up(max(pl.cdiv(n, _LANES), 1), _SUBLANES)
    padded = rows * _LANES
    tgt2d = jnp.pad(target_ids.reshape(-1), (0, padded - n)).reshape(rows, _LANES)
    mask2d = jnp.pad(mask.reshape(-1), (0, padded - n)).reshape(rows, _LANES)
    labels2d = _run_label_mask(tgt2d, mask2d, pad, allow_input_fusion=True)
    return labels2d.reshape(-1)[:n].reshape(orig_shape)


def t5_encode_feature(input_ids, attention_mask, target_ids=None,
                      decoder_attention_mask=None, pad_token_id=0, *,
                      force_pallas=False):
    """Mimics T5_Encode_Feature.forward()'s `encodings` output dict.

    The encoder-side encodings and the decoder attention mask are pure
    pass-throughs (no HBM copy); only label masking touches the TPU kernel.
    """
    encodings = {"input_ids": input_ids, "attention_mask": attention_mask}
    if target_ids is not None:
        labels = mask_labels(target_ids, decoder_attention_mask, pad_token_id,
                             force_pallas=force_pallas)
        encodings.update({"labels": labels,
                          "decoder_attention_mask": decoder_attention_mask})
    return encodings


def _synthetic_tokenize(key, batch, seq_len, vocab_size, pad_token_id):
    """Deterministic stand-in for the HF tokenizer: random ids + padding."""
    k_ids, k_len = jax.random.split(key)
    ids = jax.random.randint(k_ids, (batch, seq_len), 1, vocab_size,
                             dtype=jnp.int32)
    lengths = jax.random.randint(k_len, (batch,), 1, seq_len + 1,
                                 dtype=jnp.int32)
    pos = jnp.arange(seq_len, dtype=jnp.int32)[None, :]
    mask = (pos < lengths[:, None]).astype(jnp.int32)
    ids = jnp.where(mask == 1, ids, jnp.int32(pad_token_id))
    return ids, mask


if __name__ == "__main__":
    # Small shapes consistent with the module config:
    #   batch=2, max_input_length=16, max_target_length=8
    batch = 2
    max_input_length = 16
    max_target_length = 8
    vocab_size = 100
    pad_token_id = 0  # T5 tokenizer pad_token_id

    key = jax.random.PRNGKey(0)
    k_enc, k_tgt = jax.random.split(key)

    input_ids, attention_mask = _synthetic_tokenize(
        k_enc, batch, max_input_length, vocab_size, pad_token_id)
    target_ids, decoder_attention_mask = _synthetic_tokenize(
        k_tgt, batch, max_target_length, vocab_size, pad_token_id)

    # Force the Pallas path even at this tiny demo shape so the kernel is
    # actually compiled + executed (production would take the small fallback).
    encodings = t5_encode_feature(
        input_ids, attention_mask, target_ids, decoder_attention_mask,
        pad_token_id, force_pallas=True)
    jax.block_until_ready(encodings)

    # Reference check (plain JAX) of the forward-pass semantics.
    ref_labels = jnp.where(decoder_attention_mask == pad_token_id,
                           jnp.int32(-100), target_ids)
    assert jnp.array_equal(encodings["input_ids"], input_ids)
    assert jnp.array_equal(encodings["attention_mask"], attention_mask)
    assert jnp.array_equal(encodings["labels"], ref_labels)
    assert jnp.array_equal(encodings["decoder_attention_mask"],
                           decoder_attention_mask)

    # Also exercise the lane-aligned fast path (no wrapper repacking) and an
    # int8 decoder mask (1 B/element HBM read inside the kernel).
    tgt_big, mask_big = _synthetic_tokenize(
        jax.random.PRNGKey(1), 16, 256, vocab_size, pad_token_id)
    labels_big = mask_labels(tgt_big, mask_big.astype(jnp.int8), pad_token_id,
                             force_pallas=True)
    jax.block_until_ready(labels_big)
    ref_big = jnp.where(mask_big == pad_token_id, jnp.int32(-100), tgt_big)
    assert jnp.array_equal(labels_big, ref_big)

    print("KERNEL_OK")
</pallas_src>

<mosaic_0001>
module attributes {stable_mosaic.version = 11 : i64} {
  func.func @kernel(%arg0: i32, %arg1: memref<32x128xi32, #tpu.memory_space<vmem>>, %arg2: memref<32x128xi32, #tpu.memory_space<vmem>>, %arg3: memref<32x128xi32, #tpu.memory_space<vmem>>) attributes {dimension_semantics = [#tpu.dimension_semantics<parallel>], iteration_bounds = array<i64: 1>, scalar_prefetch = 0 : i64, scratch_operands = 0 : i64, tpu.core_type = #tpu.core_type<tc>, window_params = [{transform_indices = @transform_0, window_bounds = array<i64: 32, 128>}, {transform_indices = @transform_1, window_bounds = array<i64: 32, 128>}, {transform_indices = @transform_2, window_bounds = array<i64: 32, 128>}]} {
    %c0 = arith.constant 0 : index
    %c0_0 = arith.constant 0 : index
    %0 = vector.load %arg2[%c0, %c0_0] : memref<32x128xi32, #tpu.memory_space<vmem>>, vector<32x128xi32>
    %c0_i32 = arith.constant 0 : i32
    %1 = vector.broadcast %c0_i32 : i32 to vector<32x128xi32>
    %2 = arith.cmpi eq, %0, %1 : vector<32x128xi32>
    %c0_1 = arith.constant 0 : index
    %c0_2 = arith.constant 0 : index
    %3 = vector.load %arg1[%c0_1, %c0_2] : memref<32x128xi32, #tpu.memory_space<vmem>>, vector<32x128xi32>
    %c-100_i32 = arith.constant -100 : i32
    %4 = vector.broadcast %c-100_i32 : i32 to vector<32x128xi32>
    %5 = arith.select %2, %4, %3 : vector<32x128xi1>, vector<32x128xi32>
    %c0_3 = arith.constant 0 : index
    %c0_4 = arith.constant 0 : index
    %6 = vector.load %arg3[%c0_3, %c0_4] : memref<32x128xi32, #tpu.memory_space<vmem>>, vector<32x128xi32>
    tpu.vector_store %arg3[%c0_3, %c0_4], %5 {strides = array<i32>} : memref<32x128xi32, #tpu.memory_space<vmem>>, vector<32x128xi32>,
    return
  }
  func.func @transform_0(%arg0: i32) -> (i32, i32) {
    %c0_i32 = arith.constant 0 : i32
    %c0_i32_0 = arith.constant 0 : i32
    return %arg0, %c0_i32 : i32, i32
  }
  func.func @transform_1(%arg0: i32) -> (i32, i32) {
    %c0_i32 = arith.constant 0 : i32
    %c0_i32_0 = arith.constant 0 : i32
    return %arg0, %c0_i32 : i32, i32
  }
  func.func @transform_2(%arg0: i32) -> (i32, i32) {
    %c0_i32 = arith.constant 0 : i32
    %c0_i32_0 = arith.constant 0 : i32
    return %arg0, %c0_i32 : i32, i32
  }
}

</mosaic_0001>

<bundles_post_ra>
// kernel: tpu_custom_call.1
= control target key start
LH: loop header
LB: loop body
LE: loop exit
PB: predicated region body
PF: predicated region fallthrough
CT: control target
= control target key end

     0   :  { %7 = vsyncpa [#allocation3], 0  ;;  %s220_s0 = inlined_call_operand.hbm [shape: s32[32,128], index: 0, kind: input, shape index: {}]   ;;  %s221_s1 = inlined_call_operand.hbm [shape: s32[32,128], index: 1, kind: input, shape index: {}]   ;;  %s222_s2 = inlined_call_operand.hbm [shape: s32[32,128], index: 2, kind: output, shape index: {}]  }
   0x1   :  { %8 = vsyncpa [#allocation6], 0 }
   0x2   :  { %9 = vsyncpa [#allocation4], 0  ;;  %s155_s9 = smov [#allocation2]   ;;  %s83_s13 = scalar_lea.hbm %s220_s0, 512 }
   0x3   :  { %s15_s10 = sshll.u32 %s155_s9, 4  ;;  %p84_p0 = scmp.ne.s32.totalorder %s220_s0, %s83_s13  ;;  %s16_s10 = int_to_ptr.vmem [resolvable:$true] %s15_s10 }
   0x4   :  { %p87_p1 = scmp.lt.u32.totalorder %s83_s13, %s220_s0 }
   0x6   :  { %p89_p2 = pnand %p87_p1, %p84_p0 }
   0x8   :  { %92 = shalt.err (!%p89_p2)
}
   0x9   :  { %s93_s18 = scalar_lea.vmem %s16_s10, 512  ;;  %p98_p4 = scmp.lt.s32.totalorder %s16_s10, %s16_s10 }
   0xa   :  { %p94_p3 = scmp.ne.s32.totalorder %s16_s10, %s93_s18  ;;  %p99_p5 = scmp.lt.s32.totalorder %s93_s18, %s93_s18 }
   0xc   :  { %p100_p6 = por %p99_p5, %p98_p4 }
   0xe   :  { %p101_p7 = pnand %p100_p6, %p94_p3 }
  0x10   :  { %104 = shalt.err (!%p101_p7)
}
  0x11   :  { %s156_s19 = smov 128   ;;  %s157_s20 = smov 8  }
  0x12   :  { %21 = dma.hbm_to_vmem [thread:$0]  %s220_s0, 512, %s16_s10, [#allocation3], %s156_s19, %s156_s19, %s157_s20  }
  0x13   :  { %s158_s23 = smov [#allocation5]   ;;  %s105_s27 = scalar_lea.hbm %s221_s1, 512 }
  0x14   :  { %s27_s24 = sshll.u32 %s158_s23, 4  ;;  %p106_p8 = scmp.ne.s32.totalorder %s221_s1, %s105_s27  ;;  %s28_s24 = int_to_ptr.vmem [resolvable:$true] %s27_s24 }
  0x15   :  { %p109_p9 = scmp.lt.u32.totalorder %s105_s27, %s221_s1 }
  0x17   :  { %p111_p10 = pnand %p109_p9, %p106_p8 }
  0x19   :  { %114 = shalt.err (!%p111_p10)
}
  0x1a   :  { %s115_s4 = scalar_lea.vmem %s28_s24, 512  ;;  %p120_p12 = scmp.lt.s32.totalorder %s28_s24, %s28_s24 }
  0x1b   :  { %p116_p11 = scmp.ne.s32.totalorder %s28_s24, %s115_s4  ;;  %p121_p13 = scmp.lt.s32.totalorder %s115_s4, %s115_s4 }
  0x1d   :  { %p122_p0 = por %p121_p13, %p120_p12 }
  0x1f   :  { %p123_p1 = pnand %p122_p0, %p116_p11 }
  0x21   :  { %126 = shalt.err (!%p123_p1)
}
  0x22   :  { %33 = dma.hbm_to_vmem [thread:$0]  %s221_s1, 512, %s28_s24, [#allocation6], %s156_s19, %s156_s19, %s157_s20  }
  0x23   :  { %149 = dma.done.wait [#allocation3], 512  }
  0x24   :  { %150 = vsyncadd [#allocation3], 4294966784 }
  0x25   :  { %151 = dma.done.wait [#allocation6], 512  }
  0x26   :  { %152 = vsyncadd [#allocation6], 4294966784  ;;  %v40_v0 = vld [vmem:[#allocation5] sm:$0xff]  ;;  %v41_v2 = vld [vmem:[#allocation5 + $0x8] sm:$0xff]  ;;  %s159_s6 = smov [#allocation7]  }
  0x27   :  { %v48_v1 = vld [vmem:[#allocation2] sm:$0xff]  ;;  %s65_s7 = sshll.u32 %s159_s6, 4  ;;  %vm44_vm0 = vcmp.eq.s32.totalorder %v40_v0, 0  ;;  %vm45_vm1 = vcmp.eq.s32.totalorder %v41_v2, 0  ;;  %v49_v3 = vld [vmem:[#allocation2 + $0x8] sm:$0xff]  ;;  %v42_v4 = vld [vmem:[#allocation5 + $0x10] sm:$0xff]  ;;  %s66_s7 = int_to_ptr.vmem [resolvable:$true] %s65_s7 }
  0x28   :  { %v50_v5 = vld [vmem:[#allocation2 + $0x10] sm:$0xff]  ;;  %v52_v6 = vsel %vm44_vm0, 4294967196, %v48_v1  ;;  %v53_v7 = vsel %vm45_vm1, 4294967196, %v49_v3  ;;  %vm46_vm2 = vcmp.eq.s32.totalorder %v42_v4, 0  ;;  %v43_v8 = vld [vmem:[#allocation5 + $0x18] sm:$0xff]  ;;  %s127_s1 = scalar_lea.vmem %s66_s7, 512  ;;  %p132_p3 = scmp.lt.s32.totalorder %s66_s7, %s66_s7 }
  0x29   :  { %v51_v9 = vld [vmem:[#allocation2 + $0x18] sm:$0xff]  ;;  %56 = vst [vmem:[#allocation7] sm:$0xff] %v52_v6  ;;  %57 = vst [vmem:[#allocation7 + $0x8] sm:$0xff] %v53_v7  ;;  %v54_v10 = vsel %vm46_vm2, 4294967196, %v50_v5  ;;  %vm47_vm3 = vcmp.eq.s32.totalorder %v43_v8, 0  ;;  %p128_p2 = scmp.ne.s32.totalorder %s66_s7, %s127_s1  ;;  %p133_p4 = scmp.lt.s32.totalorder %s127_s1, %s127_s1 }
  0x2a   :  { %58 = vst [vmem:[#allocation7 + $0x10] sm:$0xff] %v54_v10  ;;  %v55_v11 = vsel %vm47_vm3, 4294967196, %v51_v9 }
  0x2b   :  { %59 = vst [vmem:[#allocation7 + $0x18] sm:$0xff] %v55_v11  ;;  %p134_p5 = por %p133_p4, %p132_p3 }
  0x2d   :  { %p135_p6 = pnand %p134_p5, %p128_p2 }
  0x2f   :  { %138 = shalt.err (!%p135_p6)
}
  0x30   :  { %s139_s10 = scalar_lea.hbm %s222_s2, 512 }
  0x31   :  { %p140_p7 = scmp.ne.s32.totalorder %s222_s2, %s139_s10  ;;  %p143_p8 = scmp.lt.u32.totalorder %s139_s10, %s222_s2 }
  0x33   :  { %p145_p9 = pnand %p143_p8, %p140_p7 }
  0x35   :  { %148 = shalt.err (!%p145_p9)
}
  0x36   :  { %71 = dma.vmem_to_hbm [thread:$0]  %s66_s7, 512, %s222_s2, [#allocation4], %s156_s19, %s156_s19, %s157_s20  }
  0x37   :  { %153 = dma.done.wait [#allocation4], 512  }
  0x38   :  { %154 = vsyncadd [#allocation4], 4294966784 }
  0x39   :  { %75 = vsyncpa [#allocation3], 1 }
  0x3a   :  { %76 = vsyncpa [#allocation6], 1 }
  0x3b   :  { %77 = vsyncpa [#allocation4], 1 }

</bundles_post_ra>
